<compile_context>
chip_gen: v6e
topology: v6e:2x2x1
jax: 0.10.0
libtpu: 0.0.40
codegen_flags: <defaults>
</compile_context>

<pallas_src>
import functools

import jax
import jax.numpy as jnp
from jax import lax
from jax.experimental import pallas as pl
from jax.experimental.pallas import tpu as pltpu


TILE_N = 128  # tokens per grid step == lane width of the output slab


def _embedding_lr_kernel(ids_ref,   # SMEM (N_pad,) int32     (scalar prefetch)
                         tbl_ref,   # HBM  (V, D)  float32    (memory_space=pl.ANY)
                         w_ref,     # VMEM (1, D)  float32    (folded linear stack)
                         out_ref,   # VMEM (1, 1, TILE_N) float32
                         xbuf,      # VMEM scratch (TILE_N, D) float32
                         sem,       # DMA semaphore, shape (1,)
                         *, tile_n, d):
    g = pl.program_id(0)
    base = g * tile_n

    # Gather tile_n embedding rows from HBM; row ids come from SMEM.
    # All DMAs are issued back-to-back (in flight concurrently), then drained.
    @pl.loop(0, tile_n)
    def _issue(i):
        idx = ids_ref[base + i]
        pltpu.make_async_copy(tbl_ref.at[idx], xbuf.at[i], sem.at[0]).start()

    @pl.loop(0, tile_n)
    def _wait(i):
        # src address is irrelevant for wait; shapes/sizes match the issued copies.
        pltpu.make_async_copy(tbl_ref.at[0], xbuf.at[i], sem.at[0]).wait()

    x = xbuf[...]                     # (tile_n, d)
    w = w_ref[...]                    # (1, d)
    # Contract on d: (1, d) x (tile_n, d) -> (1, tile_n).  Result is already
    # lane-dense (tokens live on lanes), so the store is an unmasked vst.
    out = lax.dot_general(w, x, (((1,), (1,)), ((), ())),
                          preferred_element_type=jnp.float32)
    out_ref[...] = out.reshape(1, 1, tile_n)


def embedding_lr_forward(h_packed_data, embedding_table, weights):
    """Pallas wrapper mirroring EmbeddingLR.forward."""
    assert 'mtx_e' in h_packed_data
    assert 'mtx_score' in h_packed_data
    mtx_e = h_packed_data['mtx_e']          # (B, E) int32
    _ = h_packed_data['mtx_score']          # unused by the reference forward

    B, E = mtx_e.shape
    V, D = embedding_table.shape
    N = B * E

    # Fold the bias-free linear stack: W_combined = W_0 @ W_1 @ ... -> (D, 1).
    # Exact algebraic identity; removes all per-token D->D / D->1 matmuls.
    w_combined = functools.reduce(jnp.matmul, weights)           # (D, 1)
    w_row = w_combined.reshape(1, D).astype(jnp.float32)         # (1, D)

    # Flatten and pad ids to a multiple of TILE_N; pad with id 0 (padding row).
    n_pad = ((N + TILE_N - 1) // TILE_N) * TILE_N
    num_tiles = n_pad // TILE_N
    ids_flat = jnp.pad(mtx_e.reshape(-1).astype(jnp.int32), (0, n_pad - N))

    table = embedding_table.astype(jnp.float32)

    kernel = functools.partial(_embedding_lr_kernel, tile_n=TILE_N, d=D)

    grid_spec = pltpu.PrefetchScalarGridSpec(
        num_scalar_prefetch=1,                                   # ids -> SMEM
        grid=(num_tiles,),
        in_specs=[
            pl.BlockSpec(memory_space=pl.ANY),                   # table stays in HBM
            pl.BlockSpec((1, D), lambda g, ids: (0, 0)),         # folded weights
        ],
        out_specs=pl.BlockSpec((1, 1, TILE_N), lambda g, ids: (g, 0, 0)),
        scratch_shapes=[
            pltpu.VMEM((TILE_N, D), jnp.float32),                # gathered rows
            pltpu.SemaphoreType.DMA((1,)),
        ],
    )

    flops = 2 * n_pad * D                                        # one matvec / token
    bytes_accessed = n_pad * D * 4 + n_pad * 4 + n_pad * 4 + D * 4

    out = pl.pallas_call(
        kernel,
        out_shape=jax.ShapeDtypeStruct((num_tiles, 1, TILE_N), jnp.float32),
        grid_spec=grid_spec,
        compiler_params=pltpu.CompilerParams(
            dimension_semantics=("parallel",),
            vmem_limit_bytes=32 * 1024 * 1024,
        ),
        cost_estimate=pl.CostEstimate(
            flops=flops, transcendentals=0, bytes_accessed=bytes_accessed),
    )(ids_flat, table, w_row)

    # Drop padding and restore (B, E).  Free layout plumbing in the wrapper.
    return out.reshape(-1)[:N].reshape(B, E)


def _reference_forward(mtx_e, embedding_table, weights):
    out = jnp.take(embedding_table, mtx_e, axis=0)               # (B, E, D)
    for w in weights:
        out = out @ w
    return out[..., 0]                                           # squeeze(-1)


if __name__ == "__main__":
    # Small, module-consistent shapes.
    B, E = 2, 8            # docs x entities per doc
    V, D = 64, 32          # vocab_size, embedding_dim
    LAYER = 2              # two linear layers: D->D, D->1

    key = jax.random.PRNGKey(0)
    k_emb, k_ids, k_score, *k_w = jax.random.split(key, 3 + LAYER)

    # Deterministic parameter init (synthetic; no checkpoint load).
    embedding_table = jax.random.normal(k_emb, (V, D), dtype=jnp.float32) * 0.1
    embedding_table = embedding_table.at[0].set(0.0)             # padding_idx = 0

    weights = []
    for p in range(LAYER):
        out_dim = D if p < LAYER - 1 else 1
        weights.append(
            jax.random.normal(k_w[p], (D, out_dim), dtype=jnp.float32) * 0.1
        )

    mtx_e = jax.random.randint(k_ids, (B, E), 0, V, dtype=jnp.int32)
    mtx_score = jax.random.uniform(k_score, (B, E), dtype=jnp.float32)

    h_packed_data = {'mtx_e': mtx_e, 'mtx_score': mtx_score}

    out = embedding_lr_forward(h_packed_data, embedding_table, weights)
    out = jax.block_until_ready(out)

    ref = _reference_forward(mtx_e, embedding_table, weights)
    assert out.shape == (B, E)
    assert jnp.allclose(out, ref, atol=1e-4, rtol=1e-4)

    print("KERNEL_OK")
</pallas_src>

<mosaic_0001>
module attributes {stable_mosaic.version = 11 : i64} {
  func.func @_embedding_lr_kernel(%arg0: i32, %arg1: memref<128xi32, #tpu.memory_space<smem>>, %arg2: memref<64x32xf32, #tpu.memory_space<any>>, %arg3: memref<1x32xf32, #tpu.memory_space<vmem>>, %arg4: memref<1x1x128xf32, #tpu.memory_space<vmem>>, %arg5: memref<128x32xf32, #tpu.memory_space<vmem>>, %arg6: memref<1x!tpu.dma_semaphore, #tpu.memory_space<semaphore_mem>>) attributes {dimension_semantics = [#tpu.dimension_semantics<parallel>], iteration_bounds = array<i64: 1>, scalar_prefetch = 1 : i64, scratch_operands = 2 : i64, tpu.core_type = #tpu.core_type<tc>, window_params = [{}, {pipeline_mode = #tpu.pipeline_mode<synchronous>, transform_indices = @transform_1, window_bounds = array<i64: 1, 32>}, {transform_indices = @transform_2, window_bounds = array<i64: 1, 1, 128>}]} {
    %c128_i32 = arith.constant 128 : i32
    %0 = arith.muli %arg0, %c128_i32 : i32
    %c0_i32 = arith.constant 0 : i32
    %c128_i32_0 = arith.constant 128 : i32
    %1 = arith.addi %c0_i32, %c128_i32_0 : i32
    %c1_i32 = arith.constant 1 : i32
    scf.for %arg7 = %c0_i32 to %1 step %c1_i32  : i32 {
      %c1_i32_12 = arith.constant 1 : i32
      %8 = arith.muli %arg7, %c1_i32_12 : i32
      %c0_i32_13 = arith.constant 0 : i32
      %9 = arith.addi %c0_i32_13, %8 : i32
      %10 = arith.addi %0, %9 : i32
      %11 = arith.index_cast %10 : i32 to index
      %12 = memref.load %arg1[%11] : memref<128xi32, #tpu.memory_space<smem>>
      %c0_i32_14 = arith.constant 0 : i32
      %c0_i32_15 = arith.constant 0 : i32
      %13 = tpu.memref_slice %arg2[%12, %c0_i32_15] : memref<64x32xf32, #tpu.memory_space<any>> -> memref<1x32xf32, #tpu.memory_space<any>>
      %14 = tpu.memref_squeeze %13 : memref<1x32xf32, #tpu.memory_space<any>> -> memref<32xf32, #tpu.memory_space<any>>
      %c0_i32_16 = arith.constant 0 : i32
      %15 = tpu.memref_slice %arg5[%9, %c0_i32_16] : memref<128x32xf32, #tpu.memory_space<vmem>> -> memref<1x32xf32, #tpu.memory_space<vmem>>
      %16 = tpu.memref_squeeze %15 : memref<1x32xf32, #tpu.memory_space<vmem>> -> memref<32xf32, #tpu.memory_space<vmem>>
      %17 = tpu.memref_slice %arg6[%c0_i32_14] : memref<1x!tpu.dma_semaphore, #tpu.memory_space<semaphore_mem>> -> memref<1x!tpu.dma_semaphore, #tpu.memory_space<semaphore_mem>>
      %18 = tpu.memref_squeeze %17 : memref<1x!tpu.dma_semaphore, #tpu.memory_space<semaphore_mem>> -> memref<!tpu.dma_semaphore, #tpu.memory_space<semaphore_mem>>
      tpu.enqueue_dma source(%14 : memref<32xf32, #tpu.memory_space<any>>) target(%16 : memref<32xf32, #tpu.memory_space<vmem>>) target_semaphore(%18 : memref<!tpu.dma_semaphore, #tpu.memory_space<semaphore_mem>>)
    }
    %c128_i32_1 = arith.constant 128 : i32
    %c0_i32_2 = arith.constant 0 : i32
    %c128_i32_3 = arith.constant 128 : i32
    %2 = arith.addi %c0_i32_2, %c128_i32_3 : i32
    %c1_i32_4 = arith.constant 1 : i32
    scf.for %arg7 = %c0_i32_2 to %2 step %c1_i32_4  : i32 {
      %c1_i32_12 = arith.constant 1 : i32
      %8 = arith.muli %arg7, %c1_i32_12 : i32
      %c0_i32_13 = arith.constant 0 : i32
      %9 = arith.addi %c0_i32_13, %8 : i32
      %c0_i32_14 = arith.constant 0 : i32
      %c0_i32_15 = arith.constant 0 : i32
      %c0_i32_16 = arith.constant 0 : i32
      %10 = tpu.memref_slice %arg2[%c0_i32_14, %c0_i32_16] : memref<64x32xf32, #tpu.memory_space<any>> -> memref<1x32xf32, #tpu.memory_space<any>>
      %11 = tpu.memref_squeeze %10 : memref<1x32xf32, #tpu.memory_space<any>> -> memref<32xf32, #tpu.memory_space<any>>
      %c0_i32_17 = arith.constant 0 : i32
      %12 = tpu.memref_slice %arg5[%9, %c0_i32_17] : memref<128x32xf32, #tpu.memory_space<vmem>> -> memref<1x32xf32, #tpu.memory_space<vmem>>
      %13 = tpu.memref_squeeze %12 : memref<1x32xf32, #tpu.memory_space<vmem>> -> memref<32xf32, #tpu.memory_space<vmem>>
      %14 = tpu.memref_slice %arg6[%c0_i32_15] : memref<1x!tpu.dma_semaphore, #tpu.memory_space<semaphore_mem>> -> memref<1x!tpu.dma_semaphore, #tpu.memory_space<semaphore_mem>>
      %15 = tpu.memref_squeeze %14 : memref<1x!tpu.dma_semaphore, #tpu.memory_space<semaphore_mem>> -> memref<!tpu.dma_semaphore, #tpu.memory_space<semaphore_mem>>
      tpu.wait_dma2 semaphore(%15 : memref<!tpu.dma_semaphore, #tpu.memory_space<semaphore_mem>>) src(%11 : memref<32xf32, #tpu.memory_space<any>>) dst(%13 : memref<32xf32, #tpu.memory_space<vmem>>)
    }
    %c128_i32_5 = arith.constant 128 : i32
    %c0 = arith.constant 0 : index
    %c0_6 = arith.constant 0 : index
    %3 = vector.load %arg5[%c0, %c0_6] : memref<128x32xf32, #tpu.memory_space<vmem>>, vector<128x32xf32>
    %c0_7 = arith.constant 0 : index
    %c0_8 = arith.constant 0 : index
    %4 = vector.load %arg3[%c0_7, %c0_8] : memref<1x32xf32, #tpu.memory_space<vmem>>, vector<1x32xf32>
    %cst = arith.constant dense<0.000000e+00> : vector<1x128xf32>
    %5 = tpu.matmul %4, %3, %cst {dimension_numbers = #tpu.dot_dimension_numbers<[1], [1], [0], [0], [0, 0, 1, 0], [], []>} : vector<1x32xf32>, vector<128x32xf32>, vector<1x128xf32> -> vector<1x128xf32>
    %6 = vector.shape_cast %5 : vector<1x128xf32> to vector<1x1x128xf32>
    %c0_9 = arith.constant 0 : index
    %c0_10 = arith.constant 0 : index
    %c0_11 = arith.constant 0 : index
    %7 = vector.load %arg4[%c0_9, %c0_10, %c0_11] : memref<1x1x128xf32, #tpu.memory_space<vmem>>, vector<1x1x128xf32>
    tpu.vector_store %arg4[%c0_9, %c0_10, %c0_11], %6 {strides = array<i32>} : memref<1x1x128xf32, #tpu.memory_space<vmem>>, vector<1x1x128xf32>,
    return
  }
  func.func @transform_1(%arg0: i32, %arg1: memref<128xi32, #tpu.memory_space<smem>>) -> (i32, i32) {
    %c0_i32 = arith.constant 0 : i32
    %c0_i32_0 = arith.constant 0 : i32
    %c0_i32_1 = arith.constant 0 : i32
    return %c0_i32, %c0_i32_0 : i32, i32
  }
  func.func @transform_2(%arg0: i32, %arg1: memref<128xi32, #tpu.memory_space<smem>>) -> (i32, i32, i32) {
    %c0_i32 = arith.constant 0 : i32
    %c0_i32_0 = arith.constant 0 : i32
    %c0_i32_1 = arith.constant 0 : i32
    return %arg0, %c0_i32, %c0_i32_0 : i32, i32, i32
  }
}

</mosaic_0001>

<bundles_post_ra>
// kernel: tpu_custom_call.1
= control target key start
LH: loop header
LB: loop body
LE: loop exit
PB: predicated region body
PF: predicated region fallthrough
CT: control target
= control target key end

     0   :  { %s461_s0 = inlined_call_operand.vmem [shape: s32[128], index: 0, kind: input, shape index: {}]   ;;  %s462_s1 = inlined_call_operand.vmem [shape: f32[64,32], index: 1, kind: input, shape index: {}]   ;;  %s463_s2 = inlined_call_operand.vmem [shape: f32[1,32], index: 2, kind: input, shape index: {}]   ;;  %s464_s3 = inlined_call_operand.hbm [shape: f32[1,1,128], index: 3, kind: output, shape index: {}]  }
   0x1   :  { %s8_s14 = sshll.u32 %s461_s0, 4  ;;  %s9_s14 = int_to_ptr.vmem [resolvable:$true] %s8_s14 }
   0x2   :  { %s354_s15 = scalar_lea.vmem %s9_s14, 16  ;;  %p359_p1 = scmp.lt.s32.totalorder %s9_s14, %s9_s14 }
   0x3   :  { %p355_p0 = scmp.ne.s32.totalorder %s9_s14, %s354_s15  ;;  %p360_p2 = scmp.lt.s32.totalorder %s354_s15, %s354_s15 }
   0x5   :  { %p361_p3 = por %p360_p2, %p359_p1 }
   0x7   :  { %p362_p4 = pnand %p361_p3, %p355_p0 }
   0x9   :  { %365 = shalt.err (!%p362_p4)  }
   0xa   :  { %s408_s16 = smov [#allocation5]  }
   0xb   :  { %11 = dma.vmem_to_smem %s9_s14, 16, %s408_s16, [#allocation4] }
   0xc   :  { %394 = dma.done.wait [#allocation4], 16 }
   0xd   :  { %395 = vsyncadd [#allocation4], 4294967280 }
   0xe   :  { %13 = sfence }
   0xf   :  { %14 = vsyncpa [#allocation7], 0  ;;  %s400_s17 = smov 0  }
  0x10 LB: > { %s25_s18 = sld [smem:[#allocation5 + %s402_s17]]  ;;  %s27_s21 = scalar_lea.vmem [#allocation2], %s402_s17  ;;  %s402_s17 = sphi %s400_s17, %s23_s17  }
  0x16   : > { %s26_s20 = scalar_lea.vmem %s462_s1, %s25_s18 }
  0x17   : > { %v46_v0 = vld [vmem:[%s26_s20] sm:$0x1] }
  0x18   : > { %47 = vst [vmem:[%s27_s21] sm:$0x1] %v46_v0 }
  0x19   : > { %73 = vsyncadd [#allocation3], 16  ;;  %s23_s17 = sadd.s32 1, %s402_s17  }
  0x1a   : > { %p20_p5 = scmp.ge.s32.totalorder %s23_s17, 128  }
  0x1b   :  { %s404_s22 = smov (%p20_p5), 0  }
  0x1c   :  { %22 = sbr.rel (!%p20_p5) target bundleno = 16 (0x10), region = 80 }
  0x21 LB: > { %396 = dma.done.wait [#allocation3], 16  ;;  %s406_s22 = sphi %s404_s22, %s79_s22  }
  0x22   : > { %397 = vsyncadd [#allocation3], 4294967280  ;;  %s79_s22 = sadd.s32 1, %s406_s22  }
  0x23   : > { %p76_p6 = scmp.ge.s32.totalorder %s79_s22, 128  }
  0x24   :  { %v97_v1 = vld [vmem:[#allocation2 + $0x78] sm:$0xff] (%p76_p6)  ;;  %vm99_vm0 = vcmask (%p76_p6), 261120   ;;  %v409_v2 = vmov (%p76_p6), 0.0   ;;  %vm410_vm1 = vmmov (%p76_p6), 0   ;;  %v96_v3 = vld [vmem:[#allocation2 + $0x70] sm:$0xff] (%p76_p6)  ;;  %v95_v4 = vld [vmem:[#allocation2 + $0x68] sm:$0xff] (%p76_p6) }
  0x25   :  { %78 = sbr.rel (!%p76_p6) target bundleno = 33 (0x21), region = 91  ;;  %299 = vmatprep.subr.mxu0 (%p76_p6), %v409_v2  ;;  %331 = vmatprep.mubr.msk.f32.mxu0 (%p76_p6), %vm410_vm1, %v409_v2  ;;  %v94_v5 = vld [vmem:[#allocation2 + $0x60] sm:$0xff] (%p76_p6)  ;;  %v93_v6 = vld [vmem:[#allocation2 + $0x58] sm:$0xff] (%p76_p6)  ;;  %v92_v7 = vld [vmem:[#allocation2 + $0x50] sm:$0xff] (%p76_p6)  ;;  %s411_s24 = smov (%p76_p6), [#allocation6]  }
  0x26   :  { %300 = vmatpush3.xpose.msk.msra.mxu0 (%p76_p6), %vm99_vm0, %v97_v1  ;;  %v91_v8 = vld [vmem:[#allocation2 + $0x48] sm:$0xff] (%p76_p6)  ;;  %v90_v9 = vld [vmem:[#allocation2 + $0x40] sm:$0xff] (%p76_p6)  ;;  %v89_v10 = vld [vmem:[#allocation2 + $0x38] sm:$0xff] (%p76_p6)  ;;  %s228_s25 = sshll.u32 (%p76_p6), %s411_s24, 4  ;;  %s229_s25 = int_to_ptr.vmem [resolvable:$true] %s228_s25 }
  0x27   :  { %301 = vmatprep.subr.mxu0 (%p76_p6), %v409_v2  ;;  %v88_v11 = vld [vmem:[#allocation2 + $0x30] sm:$0xff] (%p76_p6)  ;;  %v87_v12 = vld [vmem:[#allocation2 + $0x28] sm:$0xff] (%p76_p6)  ;;  %v86_v13 = vld [vmem:[#allocation2 + $0x20] sm:$0xff] (%p76_p6)  ;;  %s366_s26 = scalar_lea.vmem (%p76_p6), %s229_s25, 16  ;;  %s370_s27 = scalar_lea.vmem (%p76_p6), %s229_s25, 32 }
  0x28   :  { %v85_v14 = vld [vmem:[#allocation2 + $0x18] sm:$0xff] (%p76_p6)  ;;  %v84_v15 = vld [vmem:[#allocation2 + $0x10] sm:$0xff] (%p76_p6)  ;;  %v83_v16 = vld [vmem:[#allocation2 + $0x8] sm:$0xff] (%p76_p6)  ;;  %p367_p7 = scmp.ne.s32.totalorder (%p76_p6), %s229_s25, %s366_s26  ;;  %p371_p8 = scmp.lt.s32.totalorder (%p76_p6), %s229_s25, %s229_s25 }
  0x29   :  { %v82_v17 = vld [vmem:[#allocation2] sm:$0xff] (%p76_p6)  ;;  %p372_p9 = scmp.lt.s32.totalorder (%p76_p6), %s370_s27, %s366_s26 }
  0x2a   :  { %302 = vmatpush3.xpose.msk.msra.mxu0 %vm99_vm0, %v96_v3  ;;  %v98_v18 = vld [vmem:[%s463_s2] sm:$0x1] }
  0x2b   :  { %303 = vmatprep.subr.mxu0 %v409_v2  ;;  %p373_p10 = por %p372_p9, %p371_p8 }
  0x2d   :  { %p374_p11 = pnand %p373_p10, %p367_p7 }
  0x2e   :  { %304 = vmatpush3.xpose.msk.msra.mxu0 %vm99_vm0, %v95_v4 }
  0x2f   :  { %305 = vmatprep.subr.mxu0 %v409_v2 }
  0x32   :  { %306 = vmatpush3.xpose.msk.msra.mxu0 %vm99_vm0, %v94_v5 }
  0x33   :  { %307 = vmatprep.subr.mxu0 %v409_v2 }
  0x36   :  { %308 = vmatpush3.xpose.msk.msra.mxu0 %vm99_vm0, %v93_v6 }
  0x37   :  { %309 = vmatprep.subr.mxu0 %v409_v2 }
  0x3a   :  { %310 = vmatpush3.xpose.msk.msra.mxu0 %vm99_vm0, %v92_v7 }
  0x3b   :  { %311 = vmatprep.subr.mxu0 %v409_v2 }
  0x3e   :  { %312 = vmatpush3.xpose.msk.msra.mxu0 %vm99_vm0, %v91_v8 }
  0x3f   :  { %313 = vmatprep.subr.mxu0 %v409_v2 }
  0x42   :  { %314 = vmatpush3.xpose.msk.msra.mxu0 %vm99_vm0, %v90_v9 }
  0x43   :  { %315 = vmatprep.subr.mxu0 %v409_v2 }
  0x46   :  { %316 = vmatpush3.xpose.msk.msra.mxu0 %vm99_vm0, %v89_v10 }
  0x47   :  { %317 = vmatprep.subr.mxu0 %v409_v2 }
  0x4a   :  { %318 = vmatpush3.xpose.msk.msra.mxu0 %vm99_vm0, %v88_v11 }
  0x4b   :  { %319 = vmatprep.subr.mxu0 %v409_v2 }
  0x4e   :  { %320 = vmatpush3.xpose.msk.msra.mxu0 %vm99_vm0, %v87_v12 }
  0x4f   :  { %321 = vmatprep.subr.mxu0 %v409_v2 }
  0x52   :  { %322 = vmatpush3.xpose.msk.msra.mxu0 %vm99_vm0, %v86_v13 }
  0x53   :  { %323 = vmatprep.subr.mxu0 %v409_v2 }
  0x56   :  { %324 = vmatpush3.xpose.msk.msra.mxu0 %vm99_vm0, %v85_v14 }
  0x57   :  { %325 = vmatprep.subr.mxu0 %v409_v2 }
  0x5a   :  { %326 = vmatpush3.xpose.msk.msra.mxu0 %vm99_vm0, %v84_v15 }
  0x5b   :  { %327 = vmatprep.subr.mxu0 %v409_v2 }
  0x5e   :  { %328 = vmatpush3.xpose.msk.msra.mxu0 %vm99_vm0, %v83_v16 }
  0x5f   :  { %329 = vmatprep.subr.mxu0 %v409_v2 }
  0x62   :  { %330 = vmatpush3.xpose.msk.msra.mxu0 %vm99_vm0, %v82_v17 }
  0x65   :  { %332 = vmatmul.mubr.msk.f32.vlgmr.msra.gmra.mxu0 %vm99_vm0, %v98_v18 }
 0x125   :  { %v217_v19 = vpop.f32.mrf.mxu0 }
 0x126   :  { %221 = vst [vmem:[#allocation6] sm:$0x1] %v217_v19 }
 0x127   :  { %v333_v20 = vpop.f32.mrf.mxu0 }
 0x128   :  { %377 = shalt.err (!%p374_p11)
}
 0x129   :  { %231 = dma.vmem_to_hbm [thread:$0]  %s229_s25, 16, %s464_s3, [#allocation7]  }
 0x12a   :  { %398 = dma.done.wait [#allocation7], 16  }
 0x12b   :  { %399 = vsyncadd [#allocation7], 4294967280 }
 0x12c   :  { %235 = vsyncpa [#allocation7], 1 }
 0x12d   :  { %236 = vsyncmov [#allocation3] }
 0x130   :  { %s237_s2 = vpop.sfrf %236 }
 0x131   :  { %p281_p12 = scmp.ne.s32.totalorder %s237_s2, 0 }
 0x133   :  { %241 = shalt.err (%p281_p12)  }

</bundles_post_ra>
